<compile_context>
chip_gen: v5e
topology: v5e:2x2
jax: 0.10.0
libtpu: 0.0.40
codegen_flags: <defaults>
</compile_context>

<pallas_src>
import functools

import jax
import jax.numpy as jnp
from jax import lax
from jax.experimental import pallas as pl
from jax.experimental.pallas import tpu as pltpu

_VMEM = pl.BlockSpec(memory_space=pltpu.MemorySpace.VMEM)
_LANE = 128


# ---------------------------------------------------------------------------
# Kernels
# ---------------------------------------------------------------------------

def _initial_step_kernel(obs_ref, wr_ref, wpv_ref, aux_ref, out_ref, *, H, A):
    """obs -> [ state | policy | tanh(value) | 0.. ] lane-dense slab."""
    B = obs_ref.shape[0]
    P = out_ref.shape[-1]
    lane = lax.broadcasted_iota(jnp.int32, (B, P), 1)
    tanh_mask = lane == (H + A)

    aux = aux_ref[...]                      # [2, P]: [br_pad ; bpv_pad]
    # Wr_pad already places the state in lanes 0..H-1; other lanes are zero,
    # so a whole-vreg ReLU is safe here.
    s = jnp.maximum(
        jnp.dot(obs_ref[...], wr_ref[...],
                preferred_element_type=jnp.float32) + aux[0:1], 0.0)
    pv = jnp.dot(s, wpv_ref[...], preferred_element_type=jnp.float32) + aux[1:2]
    out_ref[...] = s + jnp.where(tanh_mask, jnp.tanh(pv), pv)


def _rollout_step_kernel(state_ref, aenc_ref, wdyn_ref, wpv_ref, aux_ref,
                         out_ref, *, H, A):
    """(state[B,H], action) -> [ next_state | policy | tanh(v) | reward | 0.. ]."""
    B = state_ref.shape[0]
    P = out_ref.shape[-1]
    lane = lax.broadcasted_iota(jnp.int32, (B, P), 1)
    relu_mask = lane < H                    # ReLU must NOT touch the reward lane
    tanh_mask = lane == (H + A)

    aux = aux_ref[...]                      # [3, P]: [act_row ; bdyn_pad ; bpv_pad]
    dyn = (jnp.dot(state_ref[...], wdyn_ref[...],
                   preferred_element_type=jnp.float32)
           + aenc_ref[...] * aux[0:1]       # folded action column (1/A baked in)
           + aux[1:2])
    dyn = jnp.where(relu_mask, jnp.maximum(dyn, 0.0), dyn)
    pv = jnp.dot(dyn, wpv_ref[...], preferred_element_type=jnp.float32) + aux[2:3]
    out_ref[...] = dyn + jnp.where(tanh_mask, jnp.tanh(pv), pv)


def _rollout_traj_kernel(aenc_ref, state0_ref, wdyn_ref, wpv_ref, aux_ref,
                         out_ref, *, H, A, T):
    """T rollout steps in one invocation; state slab carried in vregs."""
    B, P = state0_ref.shape
    # Lane masks hoisted once (not regenerated per step).
    lane = lax.broadcasted_iota(jnp.int32, (B, P), 1)
    relu_mask = lane < H
    tanh_mask = lane == (H + A)

    aux = aux_ref[...]                      # [3, P]
    act_row, bdyn, bpv = aux[0:1], aux[1:2], aux[2:3]
    wdyn = wdyn_ref[...]                    # [P, P], rows >= H are zero
    wpv = wpv_ref[...]                      # [P, P], rows >= H are zero

    s = state0_ref[...]                     # [B, P] padded state slab
    # T is small & static: fully unrolled so the LLO scheduler can overlap
    # step t's prediction matmul with step t+1's dynamics matmul.
    for t in range(T):
        a = aenc_ref[t]                     # [B, 1] (whole tensor resident in VMEM)
        dyn = (jnp.dot(s, wdyn, preferred_element_type=jnp.float32)
               + a * act_row + bdyn)
        dyn = jnp.where(relu_mask, jnp.maximum(dyn, 0.0), dyn)
        pv = jnp.dot(dyn, wpv, preferred_element_type=jnp.float32) + bpv
        slab = dyn + jnp.where(tanh_mask, jnp.tanh(pv), pv)
        out_ref[t] = slab                   # static-index full-vreg store
        s = slab                            # lanes >= H are killed by zero wdyn rows


def _init_and_rollout_kernel(obs_ref, aenc_ref, wr_ref, wdyn_ref, wpv_ref,
                             aux_ref, out_ref, *, H, A, T):
    """Fused representation + prediction (t==0) followed by T rollout steps."""
    B = obs_ref.shape[0]
    P = out_ref.shape[-1]
    lane = lax.broadcasted_iota(jnp.int32, (B, P), 1)
    relu_mask = lane < H
    tanh_mask = lane == (H + A)

    aux = aux_ref[...]                      # [4, P]: [br ; act_row ; bdyn ; bpv]
    br, act_row, bdyn, bpv = aux[0:1], aux[1:2], aux[2:3], aux[3:4]
    wdyn = wdyn_ref[...]
    wpv = wpv_ref[...]

    # initial step
    s = jnp.maximum(
        jnp.dot(obs_ref[...], wr_ref[...],
                preferred_element_type=jnp.float32) + br, 0.0)
    pv = jnp.dot(s, wpv, preferred_element_type=jnp.float32) + bpv
    s = s + jnp.where(tanh_mask, jnp.tanh(pv), pv)
    out_ref[0] = s

    # rollout steps
    for t in range(T):
        a = aenc_ref[t]
        dyn = (jnp.dot(s, wdyn, preferred_element_type=jnp.float32)
               + a * act_row + bdyn)
        dyn = jnp.where(relu_mask, jnp.maximum(dyn, 0.0), dyn)
        pv = jnp.dot(dyn, wpv, preferred_element_type=jnp.float32) + bpv
        slab = dyn + jnp.where(tanh_mask, jnp.tanh(pv), pv)
        out_ref[t + 1] = slab
        s = slab


# ---------------------------------------------------------------------------
# Agent wrapper
# ---------------------------------------------------------------------------

class MuZeroAgentPallas:
    """Pallas port of MuZero_Agent.inital_step / rollout_step."""

    def __init__(self, key, num_simulations, num_actions, obs_dim, hidden_dim):
        self.num_actions = num_actions
        self.num_simulations = num_simulations
        self.temperature = 1
        self.hidden_dim = hidden_dim

        H, A, P = hidden_dim, num_actions, _LANE
        assert H + A + 2 <= P, "hidden+actions+2 must fit in one 128-lane slab"
        self.v_lane = H + A          # value lane
        self.r_lane = H + A + 1      # reward lane

        ks = jax.random.split(key, 8)
        scale = 0.1
        f32 = jnp.float32

        # --- base (unpacked) weights, kept for the pure-JAX reference ---
        self.Wr = (scale * jax.random.normal(ks[0], (obs_dim, H))).astype(f32)
        self.br = jnp.zeros((1, H), f32)
        self.Wp = (scale * jax.random.normal(ks[1], (H, A))).astype(f32)
        self.bp = jnp.zeros((1, A), f32)
        self.Wv = (scale * jax.random.normal(ks[2], (H, 1))).astype(f32)
        self.bv = jnp.zeros((1, 1), f32)
        self.Wd_s = (scale * jax.random.normal(ks[3], (H, H))).astype(f32)
        self.Wd_a = (scale * jax.random.normal(ks[4], (1, H))).astype(f32)
        self.bd = jnp.zeros((1, H), f32)
        self.Wrw_s = (scale * jax.random.normal(ks[5], (H, 1))).astype(f32)
        self.Wrw_a = (scale * jax.random.normal(ks[6], (1, 1))).astype(f32)
        self.brw = jnp.zeros((1, 1), f32)

        # --- pre-padded, lane-dense packed parameters for the kernels ---
        # representation: obs @ Wr_pad lands the state in lanes 0..H-1
        self.Wr_pad = jnp.zeros((obs_dim, P), f32).at[:, :H].set(self.Wr)
        br_pad = jnp.zeros((1, P), f32).at[:, :H].set(self.br)
        # prediction: rows >= H zeroed so a full [B,P] slab can be fed directly;
        # policy -> lanes H..H+A-1, value -> lane H+A
        self.Wpv_pad = (jnp.zeros((P, P), f32)
                        .at[:H, H:H + A].set(self.Wp)
                        .at[:H, self.v_lane:self.v_lane + 1].set(self.Wv))
        bpv_pad = (jnp.zeros((1, P), f32)
                   .at[:, H:H + A].set(self.bp)
                   .at[:, self.v_lane:self.v_lane + 1].set(self.bv))
        # dynamics: next_state -> lanes 0..H-1, reward -> lane H+A+1;
        # rows >= H zeroed so the carried slab (containing p/v/r) is harmless.
        self.Wdyn_pad = (jnp.zeros((P, P), f32)
                         .at[:H, :H].set(self.Wd_s)
                         .at[:H, self.r_lane:self.r_lane + 1].set(self.Wrw_s))
        self.Wdyn_pad_h = self.Wdyn_pad[:H]          # [H, P] for single-step API
        # folded action column (1/num_actions baked in) + dynamics biases
        act_row = (jnp.zeros((1, P), f32)
                   .at[:, :H].set(self.Wd_a / num_actions)
                   .at[:, self.r_lane:self.r_lane + 1].set(self.Wrw_a / num_actions))
        bdyn_pad = (jnp.zeros((1, P), f32)
                    .at[:, :H].set(self.bd)
                    .at[:, self.r_lane:self.r_lane + 1].set(self.brw))

        # small aux tables (one DMA each)
        self.aux_init = jnp.concatenate([br_pad, bpv_pad], axis=0)            # [2, P]
        self.aux_roll = jnp.concatenate([act_row, bdyn_pad, bpv_pad], axis=0)  # [3, P]
        self.aux_full = jnp.concatenate([br_pad, act_row, bdyn_pad, bpv_pad],
                                        axis=0)                               # [4, P]

    # ---- slab slicing helpers (wrapper-side, outside the kernel) ----
    def _split2(self, out):         # [.., P] -> state, p, v
        H, A = self.hidden_dim, self.num_actions
        return (out[..., :H], out[..., H:H + A],
                out[..., self.v_lane:self.v_lane + 1])

    def _split3(self, out):         # [.., P] -> state, p, v, r
        s, p, v = self._split2(out)
        return s, p, v, out[..., self.r_lane:self.r_lane + 1]

    # ---------------- inital_step ----------------
    @functools.partial(jax.jit, static_argnums=0)
    def inital_step(self, obs):
        B = obs.shape[0]
        out = pl.pallas_call(
            functools.partial(_initial_step_kernel,
                              H=self.hidden_dim, A=self.num_actions),
            out_shape=jax.ShapeDtypeStruct((B, _LANE), jnp.float32),
            in_specs=[_VMEM] * 4,
            out_specs=_VMEM,
        )(obs, self.Wr_pad, self.Wpv_pad, self.aux_init)
        return self._split2(out)

    # ---------------- rollout_step ----------------
    @functools.partial(jax.jit, static_argnums=0)
    def rollout_step(self, state, action):
        B = state.shape[0]
        aenc = jnp.asarray(action, jnp.float32).reshape(B, 1)  # 1/A folded in aux
        out = pl.pallas_call(
            functools.partial(_rollout_step_kernel,
                              H=self.hidden_dim, A=self.num_actions),
            out_shape=jax.ShapeDtypeStruct((B, _LANE), jnp.float32),
            in_specs=[_VMEM] * 5,
            out_specs=_VMEM,
        )(state, aenc, self.Wdyn_pad_h, self.Wpv_pad, self.aux_roll)
        return self._split3(out)

    # ---------------- fused multi-step rollout ----------------
    @functools.partial(jax.jit, static_argnums=0)
    def rollout_trajectory(self, state, actions):
        """Run a whole action sequence [T, B] inside ONE pallas_call
        (single grid point, unrolled in-kernel loop, weights DMA'd once)."""
        T, B = actions.shape
        H = self.hidden_dim
        aenc = jnp.asarray(actions, jnp.float32)[:, :, None]           # [T, B, 1]
        state0 = jnp.pad(state, ((0, 0), (0, _LANE - H)))              # lane-dense slab
        out = pl.pallas_call(
            functools.partial(_rollout_traj_kernel,
                              H=H, A=self.num_actions, T=T),
            out_shape=jax.ShapeDtypeStruct((T, B, _LANE), jnp.float32),
            in_specs=[_VMEM] * 5,
            out_specs=_VMEM,
        )(aenc, state0, self.Wdyn_pad, self.Wpv_pad, self.aux_roll)
        return self._split3(out)

    # ---------------- fused initial step + rollout ----------------
    @functools.partial(jax.jit, static_argnums=0)
    def mcts_rollout(self, obs, actions):
        """Fused representation + prediction + T dynamics/prediction steps in
        one kernel launch.  Output index 0 is the initial step, 1..T the
        rollout steps (reward at index 0 is zero / unused)."""
        T, B = actions.shape
        aenc = jnp.asarray(actions, jnp.float32)[:, :, None]           # [T, B, 1]
        out = pl.pallas_call(
            functools.partial(_init_and_rollout_kernel,
                              H=self.hidden_dim, A=self.num_actions, T=T),
            out_shape=jax.ShapeDtypeStruct((T + 1, B, _LANE), jnp.float32),
            in_specs=[_VMEM] * 6,
            out_specs=_VMEM,
        )(obs, aenc, self.Wr_pad, self.Wdyn_pad, self.Wpv_pad, self.aux_full)
        return self._split3(out)

    # TODO(synk): mcts_inference uses host-side numpy RNG + MCTS tree-search
    # control flow; no clean single-kernel Pallas equivalent, left out.


# ---------------------------------------------------------------------------
# Pure-JAX reference
# ---------------------------------------------------------------------------

def _ref_initial_step(agent, obs):
    state = jnp.maximum(obs @ agent.Wr + agent.br, 0.0)
    p = state @ agent.Wp + agent.bp
    v = jnp.tanh(state @ agent.Wv + agent.bv)
    return state, p, v


def _ref_rollout_step(agent, state, action):
    B = state.shape[0]
    a = jnp.asarray(action, jnp.float32).reshape(B, 1) / agent.num_actions
    ns = jnp.maximum(state @ agent.Wd_s + a * agent.Wd_a + agent.bd, 0.0)
    r = state @ agent.Wrw_s + a * agent.Wrw_a + agent.brw
    p = ns @ agent.Wp + agent.bp
    v = jnp.tanh(ns @ agent.Wv + agent.bv)
    return ns, p, v, r


# ---------------------------------------------------------------------------
# Main
# ---------------------------------------------------------------------------

if __name__ == "__main__":
    key = jax.random.PRNGKey(0)
    B, OBS, H, A, T = 8, 16, 32, 4, 5

    agent = MuZeroAgentPallas(key, num_simulations=8, num_actions=A,
                              obs_dim=OBS, hidden_dim=H)

    obs = jax.random.normal(jax.random.fold_in(key, 1), (B, OBS), jnp.float32)
    actions = jnp.arange(B, dtype=jnp.int32) % A
    traj_actions = (jax.random.randint(jax.random.fold_in(key, 2), (T, B), 0, A)
                    .astype(jnp.int32))

    # inital_step: obs -> (state, p, v)
    state, p, v = agent.inital_step(obs)
    jax.block_until_ready((state, p, v))

    # rollout_step: (state, action) -> (next_state, p, v, reward)
    ns, p2, v2, r = agent.rollout_step(state, actions)
    jax.block_until_ready((ns, p2, v2, r))

    # fused multi-step rollout: (state, actions[T,B]) -> per-step outputs
    tns, tp, tv, tr = agent.rollout_trajectory(state, traj_actions)
    jax.block_until_ready((tns, tp, tv, tr))

    # fused initial + rollout: (obs, actions[T,B]) -> (T+1) per-step outputs
    fns, fp, fv, fr = agent.mcts_rollout(obs, traj_actions)
    jax.block_until_ready((fns, fp, fv, fr))

    # ----- sanity-check against the pure-JAX reference -----
    tol = dict(atol=1e-4, rtol=1e-4)
    rs, rp, rv = _ref_initial_step(agent, obs)
    rns, rp2, rv2, rr = _ref_rollout_step(agent, state, actions)
    for got, want in [(state, rs), (p, rp), (v, rv),
                      (ns, rns), (p2, rp2), (v2, rv2), (r, rr),
                      (fns[0], rs), (fp[0], rp), (fv[0], rv)]:
        assert jnp.allclose(got, want, **tol), "mismatch vs reference"

    s_ref = state
    for t in range(T):
        s_ref, pp, vv, rrw = _ref_rollout_step(agent, s_ref, traj_actions[t])
        assert jnp.allclose(tns[t], s_ref, **tol), "traj state mismatch"
        assert jnp.allclose(tp[t], pp, **tol), "traj policy mismatch"
        assert jnp.allclose(tv[t], vv, **tol), "traj value mismatch"
        assert jnp.allclose(tr[t], rrw, **tol), "traj reward mismatch"
        assert jnp.allclose(fns[t + 1], s_ref, **tol), "fused state mismatch"
        assert jnp.allclose(fp[t + 1], pp, **tol), "fused policy mismatch"
        assert jnp.allclose(fv[t + 1], vv, **tol), "fused value mismatch"
        assert jnp.allclose(fr[t + 1], rrw, **tol), "fused reward mismatch"

    print("KERNEL_OK")
</pallas_src>

<mosaic_0001>
module attributes {stable_mosaic.version = 11 : i64} {
  func.func @_initial_step_kernel(%arg0: memref<8x16xf32, #tpu.memory_space<vmem>>, %arg1: memref<16x128xf32, #tpu.memory_space<vmem>>, %arg2: memref<128x128xf32, #tpu.memory_space<vmem>>, %arg3: memref<2x128xf32, #tpu.memory_space<vmem>>, %arg4: memref<8x128xf32, #tpu.memory_space<vmem>>) attributes {dimension_semantics = [], scalar_prefetch = 0 : i64, scratch_operands = 0 : i64, tpu.core_type = #tpu.core_type<tc>} {
    %0 = tpu.iota {dimensions = array<i32: 1>} : vector<8x128xi32>
    %c36_i32 = arith.constant 36 : i32
    %1 = vector.broadcast %c36_i32 : i32 to vector<8x128xi32>
    %2 = arith.cmpi eq, %0, %1 : vector<8x128xi32>
    %c0 = arith.constant 0 : index
    %c0_0 = arith.constant 0 : index
    %3 = vector.load %arg3[%c0, %c0_0] : memref<2x128xf32, #tpu.memory_space<vmem>>, vector<2x128xf32>
    %c0_1 = arith.constant 0 : index
    %c0_2 = arith.constant 0 : index
    %4 = vector.load %arg0[%c0_1, %c0_2] : memref<8x16xf32, #tpu.memory_space<vmem>>, vector<8x16xf32>
    %c0_3 = arith.constant 0 : index
    %c0_4 = arith.constant 0 : index
    %5 = vector.load %arg1[%c0_3, %c0_4] : memref<16x128xf32, #tpu.memory_space<vmem>>, vector<16x128xf32>
    %cst = arith.constant dense<0.000000e+00> : vector<8x128xf32>
    %6 = tpu.matmul %4, %5, %cst {dimension_numbers = #tpu.dot_dimension_numbers<[1], [0], [0], [1], [0, 0, 1, 1], [], []>} : vector<8x16xf32>, vector<16x128xf32>, vector<8x128xf32> -> vector<8x128xf32>
    %7 = vector.extract_strided_slice %3 {offsets = [0, 0], sizes = [1, 128], strides = [1, 1]} : vector<2x128xf32> to vector<1x128xf32>
    %8 = vector.broadcast %7 : vector<1x128xf32> to vector<8x128xf32>
    %9 = arith.addf %6, %8 : vector<8x128xf32>
    %cst_5 = arith.constant 0.000000e+00 : f32
    %10 = vector.broadcast %cst_5 : f32 to vector<8x128xf32>
    %11 = arith.maximumf %9, %10 : vector<8x128xf32>
    %c0_6 = arith.constant 0 : index
    %c0_7 = arith.constant 0 : index
    %12 = vector.load %arg2[%c0_6, %c0_7] : memref<128x128xf32, #tpu.memory_space<vmem>>, vector<128x128xf32>
    %cst_8 = arith.constant dense<0.000000e+00> : vector<8x128xf32>
    %13 = tpu.matmul %11, %12, %cst_8 {dimension_numbers = #tpu.dot_dimension_numbers<[1], [0], [0], [1], [0, 0, 1, 1], [], []>} : vector<8x128xf32>, vector<128x128xf32>, vector<8x128xf32> -> vector<8x128xf32>
    %14 = vector.extract_strided_slice %3 {offsets = [1, 0], sizes = [1, 128], strides = [1, 1]} : vector<2x128xf32> to vector<1x128xf32>
    %15 = vector.broadcast %14 : vector<1x128xf32> to vector<8x128xf32>
    %16 = arith.addf %13, %15 : vector<8x128xf32>
    %17 = math.tanh %16 : vector<8x128xf32>
    %18 = arith.select %2, %17, %16 : vector<8x128xi1>, vector<8x128xf32>
    %19 = arith.addf %11, %18 : vector<8x128xf32>
    %c0_9 = arith.constant 0 : index
    %c0_10 = arith.constant 0 : index
    %20 = vector.load %arg4[%c0_9, %c0_10] : memref<8x128xf32, #tpu.memory_space<vmem>>, vector<8x128xf32>
    tpu.vector_store %arg4[%c0_9, %c0_10], %19 {strides = array<i32>} : memref<8x128xf32, #tpu.memory_space<vmem>>, vector<8x128xf32>,
    return
  }
}

</mosaic_0001>

<bundles_post_ra>
// kernel: inital_step.1
= control target key start
LH: loop header
LB: loop body
LE: loop exit
PB: predicated region body
PF: predicated region fallthrough
CT: control target
= control target key end

     0   :  { %9 = vsyncpa [#allocation3], 0  ;;  %s271_s0 = inlined_call_operand.hbm [shape: f32[8,16], index: 0, kind: input, shape index: {}]   ;;  %s272_s1 = inlined_call_operand.hbm [shape: f32[16,128], index: 1, kind: input, shape index: {}]   ;;  %s273_s2 = inlined_call_operand.hbm [shape: f32[128,128], index: 2, kind: input, shape index: {}]   ;;  %s274_s3 = inlined_call_operand.vmem [shape: f32[2,128], index: 3, kind: input, shape index: {}]   ;;  %s275_s4 = inlined_call_operand.vmem [shape: f32[8,128], index: 4, kind: output, shape index: {}]  }
   0x1   :  { %10 = vsyncpa [#allocation5], 0  ;;  %s26_s17 = sshll.u32 %s272_s1, 4  ;;  %s226_s18 = smov [#allocation4]   ;;  %s27_s17 = int_to_ptr.hbm [resolvable:$true] %s26_s17 }
   0x2   :  { %s28_s19 = sshll.u32 %s226_s18, 4  ;;  %s16_s22 = sshll.u32 %s271_s0, 4  ;;  %s29_s19 = int_to_ptr.vmem [resolvable:$true] %s28_s19  ;;  %s17_s22 = int_to_ptr.hbm [resolvable:$true] %s16_s22 }
   0x3   :  { %s227_s23 = smov 128   ;;  %s228_s24 = smov 8  }
   0x4   :  { %34 = dma.hbm_to_vmem [thread:$0]  %s27_s17, 256, %s29_s19, [#allocation5], %s227_s23, %s227_s23, %s228_s24  }
   0x5   :  { %s229_s25 = smov [#allocation2]   ;;  %s39_s29 = sshll.u32 %s273_s2, 4  ;;  %s40_s29 = int_to_ptr.hbm [resolvable:$true] %s39_s29 }
   0x6   :  { %s18_s26 = sshll.u32 %s229_s25, 4  ;;  %s230_s1 = smov [#allocation6]   ;;  %s19_s26 = int_to_ptr.vmem [resolvable:$true] %s18_s26 }
   0x7   :  { %21 = dma.hbm_to_vmem [thread:$0]  %s17_s22, 128, %s19_s26, [#allocation3]  }
   0x8   :  { %s41_s30 = sshll.u32 %s230_s1, 4  ;;  %s42_s30 = int_to_ptr.vmem [resolvable:$true] %s41_s30 }
   0x9   :  { %47 = dma.hbm_to_vmem [thread:$0]  %s40_s29, 2048, %s42_s30, [#allocation5], %s227_s23, %s227_s23, %s228_s24  }
   0xa   :  { %222 = dma.done.wait [#allocation3], 128  }
   0xb   :  { %223 = vsyncadd [#allocation3], 4294967168 }
   0xc   :  { %224 = dma.done.wait [#allocation5], 2304  }
   0xd   :  { %225 = vsyncadd [#allocation5], 4294964992  ;;  %v68_v0 = vld [vmem:[#allocation4 + $0x8] sm:$0xff]  ;;  %v67_v1 = vld [vmem:[#allocation4] sm:$0xff]  ;;  %vm70_vm0 = vcmask 130048   ;;  %v62_v25 = vlaneseq }
   0xe   :  { %88 = vmatpush.msra.mxu0 %v68_v0  ;;  %v66_v2 = vld [vmem:[#allocation2] sm:$0xff]  ;;  %v110_v3 = vld [vmem:[#allocation6 + $0x78] sm:$0xff]  ;;  %v109_v4 = vld [vmem:[#allocation6 + $0x70] sm:$0xff] }
   0xf   :  { %112 = vmatpush.msra.mxu1 %v110_v3  ;;  %v108_v5 = vld [vmem:[#allocation6 + $0x68] sm:$0xff]  ;;  %v107_v6 = vld [vmem:[#allocation6 + $0x60] sm:$0xff]  ;;  %v106_v7 = vld [vmem:[#allocation6 + $0x58] sm:$0xff]  ;;  %v63_v28 = vand.u32 127, %v62_v25 }
  0x10   :  { %89 = vmatpush.msra.mxu0 %v67_v1  ;;  %v105_v8 = vld [vmem:[#allocation6 + $0x50] sm:$0xff]  ;;  %v104_v9 = vld [vmem:[#allocation6 + $0x48] sm:$0xff]  ;;  %v103_v10 = vld [vmem:[#allocation6 + $0x40] sm:$0xff] }
  0x11   :  { %142 = vmatmul.msk.f32.vlgmr.msra.gmra.mxu0 %vm70_vm0, %v66_v2  ;;  %113 = vmatpush.msra.mxu1 %v109_v4  ;;  %v102_v11 = vld [vmem:[#allocation6 + $0x38] sm:$0xff]  ;;  %v101_v12 = vld [vmem:[#allocation6 + $0x30] sm:$0xff]  ;;  %v100_v13 = vld [vmem:[#allocation6 + $0x28] sm:$0xff]  ;;  %vm64_vm1 = vcmp.eq.s32.totalorder %v63_v28, 36 }
  0x12   :  { %v99_v14 = vld [vmem:[#allocation6 + $0x20] sm:$0xff]  ;;  %v98_v15 = vld [vmem:[#allocation6 + $0x18] sm:$0xff]  ;;  %v97_v16 = vld [vmem:[#allocation6 + $0x10] sm:$0xff] }
  0x13   :  { %114 = vmatpush.msra.mxu1 %v108_v5  ;;  %v96_v17 = vld [vmem:[#allocation6 + $0x8] sm:$0xff]  ;;  %v95_v18 = vld [vmem:[#allocation6] sm:$0xff] }
  0x14   :  { %v65_v19 = vld [vmem:[%s274_s3] sm:$0x3] }
  0x15   :  { %115 = vmatpush.msra.mxu1 %v107_v6  ;;  %v69_v20 = vperm.slane %v65_v19, 0  ;;  %v111_v24 = vperm.slane %v65_v19, 1 }
  0x17   :  { %116 = vmatpush.msra.mxu1 %v106_v7 }
  0x19   :  { %117 = vmatpush.msra.mxu1 %v105_v8 }
  0x1b   :  { %118 = vmatpush.msra.mxu1 %v104_v9 }
  0x1d   :  { %119 = vmatpush.msra.mxu1 %v103_v10 }
  0x1f   :  { %120 = vmatpush.msra.mxu1 %v102_v11 }
  0x21   :  { %121 = vmatpush.msra.mxu1 %v101_v12 }
  0x23   :  { %122 = vmatpush.msra.mxu1 %v100_v13 }
  0x25   :  { %123 = vmatpush.msra.mxu1 %v99_v14 }
  0x27   :  { %124 = vmatpush.msra.mxu1 %v98_v15 }
  0x29   :  { %125 = vmatpush.msra.mxu1 %v97_v16 }
  0x2b   :  { %126 = vmatpush.msra.mxu1 %v96_v17 }
  0x2d   :  { %127 = vmatpush.msra.mxu1 %v95_v18 }
  0x8e   :  { %v91_v21 = vpop.f32.mrf.mxu0 }
  0x8f   :  { %v92_v22 = vadd.f32 %v91_v21, %v69_v20 }
  0x91   :  { %v94_v23 = vmax.f32 %v92_v22, 0.0 }
  0x93   :  { %128 = vmatmul.f32.vlgmr.msra.gmra.mxu1 %v94_v23 }
 0x110   :  { %v129_v26 = vpop.f32.mrf.mxu1 }
 0x111   :  { %v130_v27 = vadd.f32 %v129_v26, %v111_v24 }
 0x113   :  { %148 = vtanh.f32 %v130_v27 }
 0x119   :  { %v149_v29 = vpop.eup %148 }
 0x11a   :  { %v133_v30 = vsel %vm64_vm1, %v149_v29, %v130_v27 }
 0x11b   :  { %v134_v31 = vadd.f32 %v133_v30, %v94_v23 }
 0x11d   :  { %135 = vst [vmem:[%s275_s4] sm:$0xff] %v134_v31 }
 0x11e   :  { %140 = vsyncpa [#allocation3], 1 }
 0x11f   :  { %141 = vsyncpa [#allocation5], 1 }

</bundles_post_ra>
